<compile_context>
chip_gen: v7x
topology: tpu7x:2x2x1
jax: 0.10.0
libtpu: 0.0.40
codegen_flags: <defaults>
</compile_context>

<pallas_src>
import jax
import jax.numpy as jnp
from jax import lax
from jax.experimental import pallas as pl
from jax.experimental.pallas import tpu as pltpu


def _lstm_kernel(gx_ref, whh_ref, h_out_ref, h_sc, c_sc):
    """Recurrent LSTM sweep over time, state carried in VMEM scratch.

    gx_ref : (T, B, 4H)  precomputed x_t @ W_ih^T + (b_ih + b_hh)
    whh_ref: (H, 4H)     recurrent weights, pre-transposed
    h_out_ref: (B, H)    final hidden state h_T
    """
    T = gx_ref.shape[0]
    H = h_sc.shape[-1]

    h_sc[...] = jnp.zeros_like(h_sc)
    c_sc[...] = jnp.zeros_like(c_sc)

    def step(t, carry):
        # Single MXU push per timestep: (B,H) @ (H,4H), added to the hoisted
        # input-projection pre-activation for this step.
        gates = gx_ref[t] + jnp.dot(h_sc[...], whh_ref[...],
                                    preferred_element_type=jnp.float32)
        i = jax.nn.sigmoid(gates[:, 0 * H:1 * H])
        f = jax.nn.sigmoid(gates[:, 1 * H:2 * H])
        g = jnp.tanh(gates[:, 2 * H:3 * H])
        o = jax.nn.sigmoid(gates[:, 3 * H:4 * H])

        c_new = f * c_sc[...] + i * g
        h_sc[...] = o * jnp.tanh(c_new)
        c_sc[...] = c_new
        return carry

    # Short, fixed trip count: fully unroll so the LLO scheduler can overlap
    # MXU / VPU / EUP work across adjacent timesteps.
    lax.fori_loop(0, T, step, 0, unroll=True)

    # Lane-dense (B, H) output; the degenerate fc matmul happens in the wrapper.
    h_out_ref[...] = h_sc[...]


def rnn_forward(park_x, params):
    """Mimics RNN.forward for rnn_type='LSTM'.

    park_x: (B, T, I)  -- batch['park_x']
    returns: (B, 1, 1)
    """
    src = jnp.transpose(park_x, (1, 0, 2)).astype(jnp.float32)   # (T, B, I)
    T, B, I = src.shape
    H = params["w_hh_t"].shape[0]

    # Hoisted input projection: one (T*B, I) @ (I, 4H) GEMM + bias, outside the
    # serial recurrence.  Bias (b_ih + b_hh) is folded in here.
    gates_x = (src.reshape(T * B, I) @ params["w_ih_t"]
               + params["b_gates"]).reshape(T, B, 4 * H)

    h_T = pl.pallas_call(
        _lstm_kernel,
        out_shape=jax.ShapeDtypeStruct((B, H), jnp.float32),
        grid_spec=pltpu.PrefetchScalarGridSpec(
            num_scalar_prefetch=0,
            grid=(1,),  # whole recurrence in one kernel invocation
            in_specs=[
                pl.BlockSpec((T, B, 4 * H), lambda i: (0, 0, 0)),  # precomputed gates
                pl.BlockSpec((H, 4 * H), lambda i: (0, 0)),        # W_hh^T
            ],
            out_specs=pl.BlockSpec((B, H), lambda i: (0, 0)),
            scratch_shapes=[
                pltpu.VMEM((B, H), jnp.float32),                   # h carry
                pltpu.VMEM((B, H), jnp.float32),                   # c carry
            ],
        ),
        compiler_params=pltpu.CompilerParams(
            dimension_semantics=("arbitrary",)),
    )(gates_x, params["w_hh_t"])

    # Final Linear on out[-1] (degenerate N=1 matmul -> do it on the host/XLA side).
    out = h_T @ params["fc_w_t"] + params["fc_b"]                  # (B, 1)
    # out[-1].unsqueeze(0).permute(1,0,2) -> (B, 1, H); fc -> (B, 1, 1)
    return out.reshape(B, 1, 1)


def _reference_forward(park_x, params):
    """Pure-JAX reference (lax.scan LSTM) for correctness checking."""
    src = jnp.transpose(park_x, (1, 0, 2))
    B = src.shape[1]
    H = params["w_hh_t"].shape[0]

    def step(carry, x_t):
        h, c = carry
        gates = x_t @ params["w_ih_t"] + h @ params["w_hh_t"] + params["b_gates"]
        i = jax.nn.sigmoid(gates[:, 0 * H:1 * H])
        f = jax.nn.sigmoid(gates[:, 1 * H:2 * H])
        g = jnp.tanh(gates[:, 2 * H:3 * H])
        o = jax.nn.sigmoid(gates[:, 3 * H:4 * H])
        c = f * c + i * g
        h = o * jnp.tanh(c)
        return (h, c), None

    h0 = jnp.zeros((B, H), jnp.float32)
    (h_T, _), _ = lax.scan(step, (h0, h0), src)
    out = h_T @ params["fc_w_t"] + params["fc_b"]
    return out.reshape(B, 1, 1)


def init_params(key, input_size, hidden_size):
    """Deterministic init mimicking PyTorch uniform(-1/sqrt(H), 1/sqrt(H))."""
    H, I = hidden_size, input_size
    k = 1.0 / jnp.sqrt(jnp.float32(H))
    keys = jax.random.split(key, 6)
    w_ih = jax.random.uniform(keys[0], (4 * H, I), jnp.float32, -k, k)
    w_hh = jax.random.uniform(keys[1], (4 * H, H), jnp.float32, -k, k)
    b_ih = jax.random.uniform(keys[2], (4 * H,), jnp.float32, -k, k)
    b_hh = jax.random.uniform(keys[3], (4 * H,), jnp.float32, -k, k)
    kf = 1.0 / jnp.sqrt(jnp.float32(H))  # fc in_features = H * num_directions
    fc_w = jax.random.uniform(keys[4], (1, H), jnp.float32, -kf, kf)
    fc_b = jax.random.uniform(keys[5], (1,), jnp.float32, -kf, kf)
    return {
        "w_ih_t": w_ih.T,                              # (I, 4H)
        "w_hh_t": w_hh.T,                              # (H, 4H)
        "b_gates": (b_ih + b_hh).reshape(1, 4 * H),    # (1, 4H)
        "fc_w_t": fc_w.T,                              # (H, 1)
        "fc_b": fc_b.reshape(1, 1),                    # (1, 1)
    }


if __name__ == "__main__":
    # batch=8 (sublane-aligned), seq=8, input_size=16, hidden_size=64 (module default)
    B, T, I, H = 8, 8, 16, 64

    key = jax.random.PRNGKey(0)
    k_x, k_p = jax.random.split(key)
    park_x = jax.random.normal(k_x, (B, T, I), jnp.float32)   # batch['park_x']
    params = init_params(k_p, I, H)

    out = rnn_forward(park_x, params)
    out = jax.block_until_ready(out)

    ref = _reference_forward(park_x, params)
    assert out.shape == (B, 1, 1)
    assert jnp.allclose(out, ref, atol=1e-5, rtol=1e-5), (out, ref)

    # TODO(synk): for v7x at large B, add a "parallel" batch-chunk grid axis to use
    # the second TensorCore; unnecessary at these toy sizes.
    print("KERNEL_OK")
</pallas_src>

<mosaic_0001>
module attributes {stable_mosaic.version = 11 : i64} {
  func.func @_lstm_kernel(%arg0: i32, %arg1: memref<8x8x256xf32, #tpu.memory_space<vmem>>, %arg2: memref<64x256xf32, #tpu.memory_space<vmem>>, %arg3: memref<8x64xf32, #tpu.memory_space<vmem>>, %arg4: memref<8x64xf32, #tpu.memory_space<vmem>>, %arg5: memref<8x64xf32, #tpu.memory_space<vmem>>) attributes {dimension_semantics = [#tpu.dimension_semantics<arbitrary>], iteration_bounds = array<i64: 1>, scalar_prefetch = 0 : i64, scratch_operands = 2 : i64, tpu.core_type = #tpu.core_type<tc>, window_params = [{pipeline_mode = #tpu.pipeline_mode<synchronous>, transform_indices = @transform_0, window_bounds = array<i64: 8, 8, 256>}, {pipeline_mode = #tpu.pipeline_mode<synchronous>, transform_indices = @transform_1, window_bounds = array<i64: 64, 256>}, {pipeline_mode = #tpu.pipeline_mode<synchronous>, transform_indices = @transform_2, window_bounds = array<i64: 8, 64>}]} {
    %cst = arith.constant 0.000000e+00 : f32
    %0 = vector.broadcast %cst : f32 to vector<8x64xf32>
    %c0 = arith.constant 0 : index
    %c0_0 = arith.constant 0 : index
    %1 = vector.load %arg4[%c0, %c0_0] : memref<8x64xf32, #tpu.memory_space<vmem>>, vector<8x64xf32>
    tpu.vector_store %arg4[%c0, %c0_0], %0 {strides = array<i32>} : memref<8x64xf32, #tpu.memory_space<vmem>>, vector<8x64xf32>,
    %cst_1 = arith.constant 0.000000e+00 : f32
    %2 = vector.broadcast %cst_1 : f32 to vector<8x64xf32>
    %c0_2 = arith.constant 0 : index
    %c0_3 = arith.constant 0 : index
    %3 = vector.load %arg5[%c0_2, %c0_3] : memref<8x64xf32, #tpu.memory_space<vmem>>, vector<8x64xf32>
    tpu.vector_store %arg5[%c0_2, %c0_3], %2 {strides = array<i32>} : memref<8x64xf32, #tpu.memory_space<vmem>>, vector<8x64xf32>,
    %c0_i32 = arith.constant 0 : i32
    %4 = arith.index_cast %c0_i32 : i32 to index
    %c0_4 = arith.constant 0 : index
    %c0_5 = arith.constant 0 : index
    %5 = vector.load %arg1[%4, %c0_4, %c0_5] : memref<8x8x256xf32, #tpu.memory_space<vmem>>, vector<1x8x256xf32>
    %6 = vector.shape_cast %5 : vector<1x8x256xf32> to vector<8x256xf32>
    %c0_6 = arith.constant 0 : index
    %c0_7 = arith.constant 0 : index
    %7 = vector.load %arg4[%c0_6, %c0_7] : memref<8x64xf32, #tpu.memory_space<vmem>>, vector<8x64xf32>
    %c0_8 = arith.constant 0 : index
    %c0_9 = arith.constant 0 : index
    %8 = vector.load %arg2[%c0_8, %c0_9] : memref<64x256xf32, #tpu.memory_space<vmem>>, vector<64x256xf32>
    %cst_10 = arith.constant dense<0.000000e+00> : vector<8x256xf32>
    %9 = tpu.matmul %7, %8, %cst_10 {dimension_numbers = #tpu.dot_dimension_numbers<[1], [0], [0], [1], [0, 0, 1, 1], [], []>} : vector<8x64xf32>, vector<64x256xf32>, vector<8x256xf32> -> vector<8x256xf32>
    %10 = arith.addf %6, %9 : vector<8x256xf32>
    %11 = vector.extract_strided_slice %10 {offsets = [0, 0], sizes = [8, 64], strides = [1, 1]} : vector<8x256xf32> to vector<8x64xf32>
    %12 = arith.negf %11 : vector<8x64xf32>
    %13 = math.exp %12 : vector<8x64xf32>
    %cst_11 = arith.constant 1.000000e+00 : f32
    %14 = vector.broadcast %cst_11 : f32 to vector<8x64xf32>
    %15 = arith.addf %14, %13 : vector<8x64xf32>
    %16 = arith.divf %14, %15 : vector<8x64xf32>
    %17 = vector.extract_strided_slice %10 {offsets = [0, 64], sizes = [8, 64], strides = [1, 1]} : vector<8x256xf32> to vector<8x64xf32>
    %18 = arith.negf %17 : vector<8x64xf32>
    %19 = math.exp %18 : vector<8x64xf32>
    %cst_12 = arith.constant 1.000000e+00 : f32
    %20 = vector.broadcast %cst_12 : f32 to vector<8x64xf32>
    %21 = arith.addf %20, %19 : vector<8x64xf32>
    %22 = arith.divf %20, %21 : vector<8x64xf32>
    %23 = vector.extract_strided_slice %10 {offsets = [0, 128], sizes = [8, 64], strides = [1, 1]} : vector<8x256xf32> to vector<8x64xf32>
    %24 = math.tanh %23 : vector<8x64xf32>
    %25 = vector.extract_strided_slice %10 {offsets = [0, 192], sizes = [8, 64], strides = [1, 1]} : vector<8x256xf32> to vector<8x64xf32>
    %26 = arith.negf %25 : vector<8x64xf32>
    %27 = math.exp %26 : vector<8x64xf32>
    %cst_13 = arith.constant 1.000000e+00 : f32
    %28 = vector.broadcast %cst_13 : f32 to vector<8x64xf32>
    %29 = arith.addf %28, %27 : vector<8x64xf32>
    %30 = arith.divf %28, %29 : vector<8x64xf32>
    %c0_14 = arith.constant 0 : index
    %c0_15 = arith.constant 0 : index
    %31 = vector.load %arg5[%c0_14, %c0_15] : memref<8x64xf32, #tpu.memory_space<vmem>>, vector<8x64xf32>
    %32 = arith.mulf %22, %31 : vector<8x64xf32>
    %33 = arith.mulf %16, %24 : vector<8x64xf32>
    %34 = arith.addf %32, %33 : vector<8x64xf32>
    %35 = math.tanh %34 : vector<8x64xf32>
    %36 = arith.mulf %30, %35 : vector<8x64xf32>
    %c0_16 = arith.constant 0 : index
    %c0_17 = arith.constant 0 : index
    %37 = vector.load %arg4[%c0_16, %c0_17] : memref<8x64xf32, #tpu.memory_space<vmem>>, vector<8x64xf32>
    tpu.vector_store %arg4[%c0_16, %c0_17], %36 {strides = array<i32>} : memref<8x64xf32, #tpu.memory_space<vmem>>, vector<8x64xf32>,
    %c0_18 = arith.constant 0 : index
    %c0_19 = arith.constant 0 : index
    %38 = vector.load %arg5[%c0_18, %c0_19] : memref<8x64xf32, #tpu.memory_space<vmem>>, vector<8x64xf32>
    tpu.vector_store %arg5[%c0_18, %c0_19], %34 {strides = array<i32>} : memref<8x64xf32, #tpu.memory_space<vmem>>, vector<8x64xf32>,
    %c1_i32 = arith.constant 1 : i32
    %39 = arith.index_cast %c1_i32 : i32 to index
    %c0_20 = arith.constant 0 : index
    %c0_21 = arith.constant 0 : index
    %40 = vector.load %arg1[%39, %c0_20, %c0_21] : memref<8x8x256xf32, #tpu.memory_space<vmem>>, vector<1x8x256xf32>
    %41 = vector.shape_cast %40 : vector<1x8x256xf32> to vector<8x256xf32>
    %c0_22 = arith.constant 0 : index
    %c0_23 = arith.constant 0 : index
    %42 = vector.load %arg4[%c0_22, %c0_23] : memref<8x64xf32, #tpu.memory_space<vmem>>, vector<8x64xf32>
    %c0_24 = arith.constant 0 : index
    %c0_25 = arith.constant 0 : index
    %43 = vector.load %arg2[%c0_24, %c0_25] : memref<64x256xf32, #tpu.memory_space<vmem>>, vector<64x256xf32>
    %cst_26 = arith.constant dense<0.000000e+00> : vector<8x256xf32>
    %44 = tpu.matmul %42, %43, %cst_26 {dimension_numbers = #tpu.dot_dimension_numbers<[1], [0], [0], [1], [0, 0, 1, 1], [], []>} : vector<8x64xf32>, vector<64x256xf32>, vector<8x256xf32> -> vector<8x256xf32>
    %45 = arith.addf %41, %44 : vector<8x256xf32>
    %46 = vector.extract_strided_slice %45 {offsets = [0, 0], sizes = [8, 64], strides = [1, 1]} : vector<8x256xf32> to vector<8x64xf32>
    %47 = arith.negf %46 : vector<8x64xf32>
    %48 = math.exp %47 : vector<8x64xf32>
    %cst_27 = arith.constant 1.000000e+00 : f32
    %49 = vector.broadcast %cst_27 : f32 to vector<8x64xf32>
    %50 = arith.addf %49, %48 : vector<8x64xf32>
    %51 = arith.divf %49, %50 : vector<8x64xf32>
    %52 = vector.extract_strided_slice %45 {offsets = [0, 64], sizes = [8, 64], strides = [1, 1]} : vector<8x256xf32> to vector<8x64xf32>
    %53 = arith.negf %52 : vector<8x64xf32>
    %54 = math.exp %53 : vector<8x64xf32>
    %cst_28 = arith.constant 1.000000e+00 : f32
    %55 = vector.broadcast %cst_28 : f32 to vector<8x64xf32>
    %56 = arith.addf %55, %54 : vector<8x64xf32>
    %57 = arith.divf %55, %56 : vector<8x64xf32>
    %58 = vector.extract_strided_slice %45 {offsets = [0, 128], sizes = [8, 64], strides = [1, 1]} : vector<8x256xf32> to vector<8x64xf32>
    %59 = math.tanh %58 : vector<8x64xf32>
    %60 = vector.extract_strided_slice %45 {offsets = [0, 192], sizes = [8, 64], strides = [1, 1]} : vector<8x256xf32> to vector<8x64xf32>
    %61 = arith.negf %60 : vector<8x64xf32>
    %62 = math.exp %61 : vector<8x64xf32>
    %cst_29 = arith.constant 1.000000e+00 : f32
    %63 = vector.broadcast %cst_29 : f32 to vector<8x64xf32>
    %64 = arith.addf %63, %62 : vector<8x64xf32>
    %65 = arith.divf %63, %64 : vector<8x64xf32>
    %c0_30 = arith.constant 0 : index
    %c0_31 = arith.constant 0 : index
    %66 = vector.load %arg5[%c0_30, %c0_31] : memref<8x64xf32, #tpu.memory_space<vmem>>, vector<8x64xf32>
    %67 = arith.mulf %57, %66 : vector<8x64xf32>
    %68 = arith.mulf %51, %59 : vector<8x64xf32>
    %69 = arith.addf %67, %68 : vector<8x64xf32>
    %70 = math.tanh %69 : vector<8x64xf32>
    %71 = arith.mulf %65, %70 : vector<8x64xf32>
    %c0_32 = arith.constant 0 : index
    %c0_33 = arith.constant 0 : index
    %72 = vector.load %arg4[%c0_32, %c0_33] : memref<8x64xf32, #tpu.memory_space<vmem>>, vector<8x64xf32>
    tpu.vector_store %arg4[%c0_32, %c0_33], %71 {strides = array<i32>} : memref<8x64xf32, #tpu.memory_space<vmem>>, vector<8x64xf32>,
    %c0_34 = arith.constant 0 : index
    %c0_35 = arith.constant 0 : index
    %73 = vector.load %arg5[%c0_34, %c0_35] : memref<8x64xf32, #tpu.memory_space<vmem>>, vector<8x64xf32>
    tpu.vector_store %arg5[%c0_34, %c0_35], %69 {strides = array<i32>} : memref<8x64xf32, #tpu.memory_space<vmem>>, vector<8x64xf32>,
    %c2_i32 = arith.constant 2 : i32
    %74 = arith.index_cast %c2_i32 : i32 to index
    %c0_36 = arith.constant 0 : index
    %c0_37 = arith.constant 0 : index
    %75 = vector.load %arg1[%74, %c0_36, %c0_37] : memref<8x8x256xf32, #tpu.memory_space<vmem>>, vector<1x8x256xf32>
    %76 = vector.shape_cast %75 : vector<1x8x256xf32> to vector<8x256xf32>
    %c0_38 = arith.constant 0 : index
    %c0_39 = arith.constant 0 : index
    %77 = vector.load %arg4[%c0_38, %c0_39] : memref<8x64xf32, #tpu.memory_space<vmem>>, vector<8x64xf32>
    %c0_40 = arith.constant 0 : index
    %c0_41 = arith.constant 0 : index
    %78 = vector.load %arg2[%c0_40, %c0_41] : memref<64x256xf32, #tpu.memory_space<vmem>>, vector<64x256xf32>
    %cst_42 = arith.constant dense<0.000000e+00> : vector<8x256xf32>
    %79 = tpu.matmul %77, %78, %cst_42 {dimension_numbers = #tpu.dot_dimension_numbers<[1], [0], [0], [1], [0, 0, 1, 1], [], []>} : vector<8x64xf32>, vector<64x256xf32>, vector<8x256xf32> -> vector<8x256xf32>
    %80 = arith.addf %76, %79 : vector<8x256xf32>
    %81 = vector.extract_strided_slice %80 {offsets = [0, 0], sizes = [8, 64], strides = [1, 1]} : vector<8x256xf32> to vector<8x64xf32>
    %82 = arith.negf %81 : vector<8x64xf32>
    %83 = math.exp %82 : vector<8x64xf32>
    %cst_43 = arith.constant 1.000000e+00 : f32
    %84 = vector.broadcast %cst_43 : f32 to vector<8x64xf32>
    %85 = arith.addf %84, %83 : vector<8x64xf32>
    %86 = arith.divf %84, %85 : vector<8x64xf32>
    %87 = vector.extract_strided_slice %80 {offsets = [0, 64], sizes = [8, 64], strides = [1, 1]} : vector<8x256xf32> to vector<8x64xf32>
    %88 = arith.negf %87 : vector<8x64xf32>
    %89 = math.exp %88 : vector<8x64xf32>
    %cst_44 = arith.constant 1.000000e+00 : f32
    %90 = vector.broadcast %cst_44 : f32 to vector<8x64xf32>
    %91 = arith.addf %90, %89 : vector<8x64xf32>
    %92 = arith.divf %90, %91 : vector<8x64xf32>
    %93 = vector.extract_strided_slice %80 {offsets = [0, 128], sizes = [8, 64], strides = [1, 1]} : vector<8x256xf32> to vector<8x64xf32>
    %94 = math.tanh %93 : vector<8x64xf32>
    %95 = vector.extract_strided_slice %80 {offsets = [0, 192], sizes = [8, 64], strides = [1, 1]} : vector<8x256xf32> to vector<8x64xf32>
    %96 = arith.negf %95 : vector<8x64xf32>
    %97 = math.exp %96 : vector<8x64xf32>
    %cst_45 = arith.constant 1.000000e+00 : f32
    %98 = vector.broadcast %cst_45 : f32 to vector<8x64xf32>
    %99 = arith.addf %98, %97 : vector<8x64xf32>
    %100 = arith.divf %98, %99 : vector<8x64xf32>
    %c0_46 = arith.constant 0 : index
    %c0_47 = arith.constant 0 : index
    %101 = vector.load %arg5[%c0_46, %c0_47] : memref<8x64xf32, #tpu.memory_space<vmem>>, vector<8x64xf32>
    %102 = arith.mulf %92, %101 : vector<8x64xf32>
    %103 = arith.mulf %86, %94 : vector<8x64xf32>
    %104 = arith.addf %102, %103 : vector<8x64xf32>
    %105 = math.tanh %104 : vector<8x64xf32>
    %106 = arith.mulf %100, %105 : vector<8x64xf32>
    %c0_48 = arith.constant 0 : index
    %c0_49 = arith.constant 0 : index
    %107 = vector.load %arg4[%c0_48, %c0_49] : memref<8x64xf32, #tpu.memory_space<vmem>>, vector<8x64xf32>
    tpu.vector_store %arg4[%c0_48, %c0_49], %106 {strides = array<i32>} : memref<8x64xf32, #tpu.memory_space<vmem>>, vector<8x64xf32>,
    %c0_50 = arith.constant 0 : index
    %c0_51 = arith.constant 0 : index
    %108 = vector.load %arg5[%c0_50, %c0_51] : memref<8x64xf32, #tpu.memory_space<vmem>>, vector<8x64xf32>
    tpu.vector_store %arg5[%c0_50, %c0_51], %104 {strides = array<i32>} : memref<8x64xf32, #tpu.memory_space<vmem>>, vector<8x64xf32>,
    %c3_i32 = arith.constant 3 : i32
    %109 = arith.index_cast %c3_i32 : i32 to index
    %c0_52 = arith.constant 0 : index
    %c0_53 = arith.constant 0 : index
    %110 = vector.load %arg1[%109, %c0_52, %c0_53] : memref<8x8x256xf32, #tpu.memory_space<vmem>>, vector<1x8x256xf32>
    %111 = vector.shape_cast %110 : vector<1x8x256xf32> to vector<8x256xf32>
    %c0_54 = arith.constant 0 : index
    %c0_55 = arith.constant 0 : index
    %112 = vector.load %arg4[%c0_54, %c0_55] : memref<8x64xf32, #tpu.memory_space<vmem>>, vector<8x64xf32>
    %c0_56 = arith.constant 0 : index
    %c0_57 = arith.constant 0 : index
    %113 = vector.load %arg2[%c0_56, %c0_57] : memref<64x256xf32, #tpu.memory_space<vmem>>, vector<64x256xf32>
    %cst_58 = arith.constant dense<0.000000e+00> : vector<8x256xf32>
    %114 = tpu.matmul %112, %113, %cst_58 {dimension_numbers = #tpu.dot_dimension_numbers<[1], [0], [0], [1], [0, 0, 1, 1], [], []>} : vector<8x64xf32>, vector<64x256xf32>, vector<8x256xf32> -> vector<8x256xf32>
    %115 = arith.addf %111, %114 : vector<8x256xf32>
    %116 = vector.extract_strided_slice %115 {offsets = [0, 0], sizes = [8, 64], strides = [1, 1]} : vector<8x256xf32> to vector<8x64xf32>
    %117 = arith.negf %116 : vector<8x64xf32>
    %118 = math.exp %117 : vector<8x64xf32>
    %cst_59 = arith.constant 1.000000e+00 : f32
    %119 = vector.broadcast %cst_59 : f32 to vector<8x64xf32>
    %120 = arith.addf %119, %118 : vector<8x64xf32>
    %121 = arith.divf %119, %120 : vector<8x64xf32>
    %122 = vector.extract_strided_slice %115 {offsets = [0, 64], sizes = [8, 64], strides = [1, 1]} : vector<8x256xf32> to vector<8x64xf32>
    %123 = arith.negf %122 : vector<8x64xf32>
    %124 = math.exp %123 : vector<8x64xf32>
    %cst_60 = arith.constant 1.000000e+00 : f32
    %125 = vector.broadcast %cst_60 : f32 to vector<8x64xf32>
    %126 = arith.addf %125, %124 : vector<8x64xf32>
    %127 = arith.divf %125, %126 : vector<8x64xf32>
    %128 = vector.extract_strided_slice %115 {offsets = [0, 128], sizes = [8, 64], strides = [1, 1]} : vector<8x256xf32> to vector<8x64xf32>
    %129 = math.tanh %128 : vector<8x64xf32>
    %130 = vector.extract_strided_slice %115 {offsets = [0, 192], sizes = [8, 64], strides = [1, 1]} : vector<8x256xf32> to vector<8x64xf32>
    %131 = arith.negf %130 : vector<8x64xf32>
    %132 = math.exp %131 : vector<8x64xf32>
    %cst_61 = arith.constant 1.000000e+00 : f32
    %133 = vector.broadcast %cst_61 : f32 to vector<8x64xf32>
    %134 = arith.addf %133, %132 : vector<8x64xf32>
    %135 = arith.divf %133, %134 : vector<8x64xf32>
    %c0_62 = arith.constant 0 : index
    %c0_63 = arith.constant 0 : index
    %136 = vector.load %arg5[%c0_62, %c0_63] : memref<8x64xf32, #tpu.memory_space<vmem>>, vector<8x64xf32>
    %137 = arith.mulf %127, %136 : vector<8x64xf32>
    %138 = arith.mulf %121, %129 : vector<8x64xf32>
    %139 = arith.addf %137, %138 : vector<8x64xf32>
    %140 = math.tanh %139 : vector<8x64xf32>
    %141 = arith.mulf %135, %140 : vector<8x64xf32>
    %c0_64 = arith.constant 0 : index
    %c0_65 = arith.constant 0 : index
    %142 = vector.load %arg4[%c0_64, %c0_65] : memref<8x64xf32, #tpu.memory_space<vmem>>, vector<8x64xf32>
    tpu.vector_store %arg4[%c0_64, %c0_65], %141 {strides = array<i32>} : memref<8x64xf32, #tpu.memory_space<vmem>>, vector<8x64xf32>,
    %c0_66 = arith.constant 0 : index
    %c0_67 = arith.constant 0 : index
    %143 = vector.load %arg5[%c0_66, %c0_67] : memref<8x64xf32, #tpu.memory_space<vmem>>, vector<8x64xf32>
    tpu.vector_store %arg5[%c0_66, %c0_67], %139 {strides = array<i32>} : memref<8x64xf32, #tpu.memory_space<vmem>>, vector<8x64xf32>,
    %c4_i32 = arith.constant 4 : i32
    %144 = arith.index_cast %c4_i32 : i32 to index
    %c0_68 = arith.constant 0 : index
    %c0_69 = arith.constant 0 : index
    %145 = vector.load %arg1[%144, %c0_68, %c0_69] : memref<8x8x256xf32, #tpu.memory_space<vmem>>, vector<1x8x256xf32>
    %146 = vector.shape_cast %145 : vector<1x8x256xf32> to vector<8x256xf32>
    %c0_70 = arith.constant 0 : index
    %c0_71 = arith.constant 0 : index
    %147 = vector.load %arg4[%c0_70, %c0_71] : memref<8x64xf32, #tpu.memory_space<vmem>>, vector<8x64xf32>
    %c0_72 = arith.constant 0 : index
    %c0_73 = arith.constant 0 : index
    %148 = vector.load %arg2[%c0_72, %c0_73] : memref<64x256xf32, #tpu.memory_space<vmem>>, vector<64x256xf32>
    %cst_74 = arith.constant dense<0.000000e+00> : vector<8x256xf32>
    %149 = tpu.matmul %147, %148, %cst_74 {dimension_numbers = #tpu.dot_dimension_numbers<[1], [0], [0], [1], [0, 0, 1, 1], [], []>} : vector<8x64xf32>, vector<64x256xf32>, vector<8x256xf32> -> vector<8x256xf32>
    %150 = arith.addf %146, %149 : vector<8x256xf32>
    %151 = vector.extract_strided_slice %150 {offsets = [0, 0], sizes = [8, 64], strides = [1, 1]} : vector<8x256xf32> to vector<8x64xf32>
    %152 = arith.negf %151 : vector<8x64xf32>
    %153 = math.exp %152 : vector<8x64xf32>
    %cst_75 = arith.constant 1.000000e+00 : f32
    %154 = vector.broadcast %cst_75 : f32 to vector<8x64xf32>
    %155 = arith.addf %154, %153 : vector<8x64xf32>
    %156 = arith.divf %154, %155 : vector<8x64xf32>
    %157 = vector.extract_strided_slice %150 {offsets = [0, 64], sizes = [8, 64], strides = [1, 1]} : vector<8x256xf32> to vector<8x64xf32>
    %158 = arith.negf %157 : vector<8x64xf32>
    %159 = math.exp %158 : vector<8x64xf32>
    %cst_76 = arith.constant 1.000000e+00 : f32
    %160 = vector.broadcast %cst_76 : f32 to vector<8x64xf32>
    %161 = arith.addf %160, %159 : vector<8x64xf32>
    %162 = arith.divf %160, %161 : vector<8x64xf32>
    %163 = vector.extract_strided_slice %150 {offsets = [0, 128], sizes = [8, 64], strides = [1, 1]} : vector<8x256xf32> to vector<8x64xf32>
    %164 = math.tanh %163 : vector<8x64xf32>
    %165 = vector.extract_strided_slice %150 {offsets = [0, 192], sizes = [8, 64], strides = [1, 1]} : vector<8x256xf32> to vector<8x64xf32>
    %166 = arith.negf %165 : vector<8x64xf32>
    %167 = math.exp %166 : vector<8x64xf32>
    %cst_77 = arith.constant 1.000000e+00 : f32
    %168 = vector.broadcast %cst_77 : f32 to vector<8x64xf32>
    %169 = arith.addf %168, %167 : vector<8x64xf32>
    %170 = arith.divf %168, %169 : vector<8x64xf32>
    %c0_78 = arith.constant 0 : index
    %c0_79 = arith.constant 0 : index
    %171 = vector.load %arg5[%c0_78, %c0_79] : memref<8x64xf32, #tpu.memory_space<vmem>>, vector<8x64xf32>
    %172 = arith.mulf %162, %171 : vector<8x64xf32>
    %173 = arith.mulf %156, %164 : vector<8x64xf32>
    %174 = arith.addf %172, %173 : vector<8x64xf32>
    %175 = math.tanh %174 : vector<8x64xf32>
    %176 = arith.mulf %170, %175 : vector<8x64xf32>
    %c0_80 = arith.constant 0 : index
    %c0_81 = arith.constant 0 : index
    %177 = vector.load %arg4[%c0_80, %c0_81] : memref<8x64xf32, #tpu.memory_space<vmem>>, vector<8x64xf32>
    tpu.vector_store %arg4[%c0_80, %c0_81], %176 {strides = array<i32>} : memref<8x64xf32, #tpu.memory_space<vmem>>, vector<8x64xf32>,
    %c0_82 = arith.constant 0 : index
    %c0_83 = arith.constant 0 : index
    %178 = vector.load %arg5[%c0_82, %c0_83] : memref<8x64xf32, #tpu.memory_space<vmem>>, vector<8x64xf32>
    tpu.vector_store %arg5[%c0_82, %c0_83], %174 {strides = array<i32>} : memref<8x64xf32, #tpu.memory_space<vmem>>, vector<8x64xf32>,
    %c5_i32 = arith.constant 5 : i32
    %179 = arith.index_cast %c5_i32 : i32 to index
    %c0_84 = arith.constant 0 : index
    %c0_85 = arith.constant 0 : index
    %180 = vector.load %arg1[%179, %c0_84, %c0_85] : memref<8x8x256xf32, #tpu.memory_space<vmem>>, vector<1x8x256xf32>
    %181 = vector.shape_cast %180 : vector<1x8x256xf32> to vector<8x256xf32>
    %c0_86 = arith.constant 0 : index
    %c0_87 = arith.constant 0 : index
    %182 = vector.load %arg4[%c0_86, %c0_87] : memref<8x64xf32, #tpu.memory_space<vmem>>, vector<8x64xf32>
    %c0_88 = arith.constant 0 : index
    %c0_89 = arith.constant 0 : index
    %183 = vector.load %arg2[%c0_88, %c0_89] : memref<64x256xf32, #tpu.memory_space<vmem>>, vector<64x256xf32>
    %cst_90 = arith.constant dense<0.000000e+00> : vector<8x256xf32>
    %184 = tpu.matmul %182, %183, %cst_90 {dimension_numbers = #tpu.dot_dimension_numbers<[1], [0], [0], [1], [0, 0, 1, 1], [], []>} : vector<8x64xf32>, vector<64x256xf32>, vector<8x256xf32> -> vector<8x256xf32>
    %185 = arith.addf %181, %184 : vector<8x256xf32>
    %186 = vector.extract_strided_slice %185 {offsets = [0, 0], sizes = [8, 64], strides = [1, 1]} : vector<8x256xf32> to vector<8x64xf32>
    %187 = arith.negf %186 : vector<8x64xf32>
    %188 = math.exp %187 : vector<8x64xf32>
    %cst_91 = arith.constant 1.000000e+00 : f32
    %189 = vector.broadcast %cst_91 : f32 to vector<8x64xf32>
    %190 = arith.addf %189, %188 : vector<8x64xf32>
    %191 = arith.divf %189, %190 : vector<8x64xf32>
    %192 = vector.extract_strided_slice %185 {offsets = [0, 64], sizes = [8, 64], strides = [1, 1]} : vector<8x256xf32> to vector<8x64xf32>
    %193 = arith.negf %192 : vector<8x64xf32>
    %194 = math.exp %193 : vector<8x64xf32>
    %cst_92 = arith.constant 1.000000e+00 : f32
    %195 = vector.broadcast %cst_92 : f32 to vector<8x64xf32>
    %196 = arith.addf %195, %194 : vector<8x64xf32>
    %197 = arith.divf %195, %196 : vector<8x64xf32>
    %198 = vector.extract_strided_slice %185 {offsets = [0, 128], sizes = [8, 64], strides = [1, 1]} : vector<8x256xf32> to vector<8x64xf32>
    %199 = math.tanh %198 : vector<8x64xf32>
    %200 = vector.extract_strided_slice %185 {offsets = [0, 192], sizes = [8, 64], strides = [1, 1]} : vector<8x256xf32> to vector<8x64xf32>
    %201 = arith.negf %200 : vector<8x64xf32>
    %202 = math.exp %201 : vector<8x64xf32>
    %cst_93 = arith.constant 1.000000e+00 : f32
    %203 = vector.broadcast %cst_93 : f32 to vector<8x64xf32>
    %204 = arith.addf %203, %202 : vector<8x64xf32>
    %205 = arith.divf %203, %204 : vector<8x64xf32>
    %c0_94 = arith.constant 0 : index
    %c0_95 = arith.constant 0 : index
    %206 = vector.load %arg5[%c0_94, %c0_95] : memref<8x64xf32, #tpu.memory_space<vmem>>, vector<8x64xf32>
    %207 = arith.mulf %197, %206 : vector<8x64xf32>
    %208 = arith.mulf %191, %199 : vector<8x64xf32>
    %209 = arith.addf %207, %208 : vector<8x64xf32>
    %210 = math.tanh %209 : vector<8x64xf32>
    %211 = arith.mulf %205, %210 : vector<8x64xf32>
    %c0_96 = arith.constant 0 : index
    %c0_97 = arith.constant 0 : index
    %212 = vector.load %arg4[%c0_96, %c0_97] : memref<8x64xf32, #tpu.memory_space<vmem>>, vector<8x64xf32>
    tpu.vector_store %arg4[%c0_96, %c0_97], %211 {strides = array<i32>} : memref<8x64xf32, #tpu.memory_space<vmem>>, vector<8x64xf32>,
    %c0_98 = arith.constant 0 : index
    %c0_99 = arith.constant 0 : index
    %213 = vector.load %arg5[%c0_98, %c0_99] : memref<8x64xf32, #tpu.memory_space<vmem>>, vector<8x64xf32>
    tpu.vector_store %arg5[%c0_98, %c0_99], %209 {strides = array<i32>} : memref<8x64xf32, #tpu.memory_space<vmem>>, vector<8x64xf32>,
    %c6_i32 = arith.constant 6 : i32
    %214 = arith.index_cast %c6_i32 : i32 to index
    %c0_100 = arith.constant 0 : index
    %c0_101 = arith.constant 0 : index
    %215 = vector.load %arg1[%214, %c0_100, %c0_101] : memref<8x8x256xf32, #tpu.memory_space<vmem>>, vector<1x8x256xf32>
    %216 = vector.shape_cast %215 : vector<1x8x256xf32> to vector<8x256xf32>
    %c0_102 = arith.constant 0 : index
    %c0_103 = arith.constant 0 : index
    %217 = vector.load %arg4[%c0_102, %c0_103] : memref<8x64xf32, #tpu.memory_space<vmem>>, vector<8x64xf32>
    %c0_104 = arith.constant 0 : index
    %c0_105 = arith.constant 0 : index
    %218 = vector.load %arg2[%c0_104, %c0_105] : memref<64x256xf32, #tpu.memory_space<vmem>>, vector<64x256xf32>
    %cst_106 = arith.constant dense<0.000000e+00> : vector<8x256xf32>
    %219 = tpu.matmul %217, %218, %cst_106 {dimension_numbers = #tpu.dot_dimension_numbers<[1], [0], [0], [1], [0, 0, 1, 1], [], []>} : vector<8x64xf32>, vector<64x256xf32>, vector<8x256xf32> -> vector<8x256xf32>
    %220 = arith.addf %216, %219 : vector<8x256xf32>
    %221 = vector.extract_strided_slice %220 {offsets = [0, 0], sizes = [8, 64], strides = [1, 1]} : vector<8x256xf32> to vector<8x64xf32>
    %222 = arith.negf %221 : vector<8x64xf32>
    %223 = math.exp %222 : vector<8x64xf32>
    %cst_107 = arith.constant 1.000000e+00 : f32
    %224 = vector.broadcast %cst_107 : f32 to vector<8x64xf32>
    %225 = arith.addf %224, %223 : vector<8x64xf32>
    %226 = arith.divf %224, %225 : vector<8x64xf32>
    %227 = vector.extract_strided_slice %220 {offsets = [0, 64], sizes = [8, 64], strides = [1, 1]} : vector<8x256xf32> to vector<8x64xf32>
    %228 = arith.negf %227 : vector<8x64xf32>
    %229 = math.exp %228 : vector<8x64xf32>
    %cst_108 = arith.constant 1.000000e+00 : f32
    %230 = vector.broadcast %cst_108 : f32 to vector<8x64xf32>
    %231 = arith.addf %230, %229 : vector<8x64xf32>
    %232 = arith.divf %230, %231 : vector<8x64xf32>
    %233 = vector.extract_strided_slice %220 {offsets = [0, 128], sizes = [8, 64], strides = [1, 1]} : vector<8x256xf32> to vector<8x64xf32>
    %234 = math.tanh %233 : vector<8x64xf32>
    %235 = vector.extract_strided_slice %220 {offsets = [0, 192], sizes = [8, 64], strides = [1, 1]} : vector<8x256xf32> to vector<8x64xf32>
    %236 = arith.negf %235 : vector<8x64xf32>
    %237 = math.exp %236 : vector<8x64xf32>
    %cst_109 = arith.constant 1.000000e+00 : f32
    %238 = vector.broadcast %cst_109 : f32 to vector<8x64xf32>
    %239 = arith.addf %238, %237 : vector<8x64xf32>
    %240 = arith.divf %238, %239 : vector<8x64xf32>
    %c0_110 = arith.constant 0 : index
    %c0_111 = arith.constant 0 : index
    %241 = vector.load %arg5[%c0_110, %c0_111] : memref<8x64xf32, #tpu.memory_space<vmem>>, vector<8x64xf32>
    %242 = arith.mulf %232, %241 : vector<8x64xf32>
    %243 = arith.mulf %226, %234 : vector<8x64xf32>
    %244 = arith.addf %242, %243 : vector<8x64xf32>
    %245 = math.tanh %244 : vector<8x64xf32>
    %246 = arith.mulf %240, %245 : vector<8x64xf32>
    %c0_112 = arith.constant 0 : index
    %c0_113 = arith.constant 0 : index
    %247 = vector.load %arg4[%c0_112, %c0_113] : memref<8x64xf32, #tpu.memory_space<vmem>>, vector<8x64xf32>
    tpu.vector_store %arg4[%c0_112, %c0_113], %246 {strides = array<i32>} : memref<8x64xf32, #tpu.memory_space<vmem>>, vector<8x64xf32>,
    %c0_114 = arith.constant 0 : index
    %c0_115 = arith.constant 0 : index
    %248 = vector.load %arg5[%c0_114, %c0_115] : memref<8x64xf32, #tpu.memory_space<vmem>>, vector<8x64xf32>
    tpu.vector_store %arg5[%c0_114, %c0_115], %244 {strides = array<i32>} : memref<8x64xf32, #tpu.memory_space<vmem>>, vector<8x64xf32>,
    %c7_i32 = arith.constant 7 : i32
    %249 = arith.index_cast %c7_i32 : i32 to index
    %c0_116 = arith.constant 0 : index
    %c0_117 = arith.constant 0 : index
    %250 = vector.load %arg1[%249, %c0_116, %c0_117] : memref<8x8x256xf32, #tpu.memory_space<vmem>>, vector<1x8x256xf32>
    %251 = vector.shape_cast %250 : vector<1x8x256xf32> to vector<8x256xf32>
    %c0_118 = arith.constant 0 : index
    %c0_119 = arith.constant 0 : index
    %252 = vector.load %arg4[%c0_118, %c0_119] : memref<8x64xf32, #tpu.memory_space<vmem>>, vector<8x64xf32>
    %c0_120 = arith.constant 0 : index
    %c0_121 = arith.constant 0 : index
    %253 = vector.load %arg2[%c0_120, %c0_121] : memref<64x256xf32, #tpu.memory_space<vmem>>, vector<64x256xf32>
    %cst_122 = arith.constant dense<0.000000e+00> : vector<8x256xf32>
    %254 = tpu.matmul %252, %253, %cst_122 {dimension_numbers = #tpu.dot_dimension_numbers<[1], [0], [0], [1], [0, 0, 1, 1], [], []>} : vector<8x64xf32>, vector<64x256xf32>, vector<8x256xf32> -> vector<8x256xf32>
    %255 = arith.addf %251, %254 : vector<8x256xf32>
    %256 = vector.extract_strided_slice %255 {offsets = [0, 0], sizes = [8, 64], strides = [1, 1]} : vector<8x256xf32> to vector<8x64xf32>
    %257 = arith.negf %256 : vector<8x64xf32>
    %258 = math.exp %257 : vector<8x64xf32>
    %cst_123 = arith.constant 1.000000e+00 : f32
    %259 = vector.broadcast %cst_123 : f32 to vector<8x64xf32>
    %260 = arith.addf %259, %258 : vector<8x64xf32>
    %261 = arith.divf %259, %260 : vector<8x64xf32>
    %262 = vector.extract_strided_slice %255 {offsets = [0, 64], sizes = [8, 64], strides = [1, 1]} : vector<8x256xf32> to vector<8x64xf32>
    %263 = arith.negf %262 : vector<8x64xf32>
    %264 = math.exp %263 : vector<8x64xf32>
    %cst_124 = arith.constant 1.000000e+00 : f32
    %265 = vector.broadcast %cst_124 : f32 to vector<8x64xf32>
    %266 = arith.addf %265, %264 : vector<8x64xf32>
    %267 = arith.divf %265, %266 : vector<8x64xf32>
    %268 = vector.extract_strided_slice %255 {offsets = [0, 128], sizes = [8, 64], strides = [1, 1]} : vector<8x256xf32> to vector<8x64xf32>
    %269 = math.tanh %268 : vector<8x64xf32>
    %270 = vector.extract_strided_slice %255 {offsets = [0, 192], sizes = [8, 64], strides = [1, 1]} : vector<8x256xf32> to vector<8x64xf32>
    %271 = arith.negf %270 : vector<8x64xf32>
    %272 = math.exp %271 : vector<8x64xf32>
    %cst_125 = arith.constant 1.000000e+00 : f32
    %273 = vector.broadcast %cst_125 : f32 to vector<8x64xf32>
    %274 = arith.addf %273, %272 : vector<8x64xf32>
    %275 = arith.divf %273, %274 : vector<8x64xf32>
    %c0_126 = arith.constant 0 : index
    %c0_127 = arith.constant 0 : index
    %276 = vector.load %arg5[%c0_126, %c0_127] : memref<8x64xf32, #tpu.memory_space<vmem>>, vector<8x64xf32>
    %277 = arith.mulf %267, %276 : vector<8x64xf32>
    %278 = arith.mulf %261, %269 : vector<8x64xf32>
    %279 = arith.addf %277, %278 : vector<8x64xf32>
    %280 = math.tanh %279 : vector<8x64xf32>
    %281 = arith.mulf %275, %280 : vector<8x64xf32>
    %c0_128 = arith.constant 0 : index
    %c0_129 = arith.constant 0 : index
    %282 = vector.load %arg4[%c0_128, %c0_129] : memref<8x64xf32, #tpu.memory_space<vmem>>, vector<8x64xf32>
    tpu.vector_store %arg4[%c0_128, %c0_129], %281 {strides = array<i32>} : memref<8x64xf32, #tpu.memory_space<vmem>>, vector<8x64xf32>,
    %c0_130 = arith.constant 0 : index
    %c0_131 = arith.constant 0 : index
    %283 = vector.load %arg5[%c0_130, %c0_131] : memref<8x64xf32, #tpu.memory_space<vmem>>, vector<8x64xf32>
    tpu.vector_store %arg5[%c0_130, %c0_131], %279 {strides = array<i32>} : memref<8x64xf32, #tpu.memory_space<vmem>>, vector<8x64xf32>,
    %c8_i32 = arith.constant 8 : i32
    %c0_132 = arith.constant 0 : index
    %c0_133 = arith.constant 0 : index
    %284 = vector.load %arg4[%c0_132, %c0_133] : memref<8x64xf32, #tpu.memory_space<vmem>>, vector<8x64xf32>
    %c0_134 = arith.constant 0 : index
    %c0_135 = arith.constant 0 : index
    %285 = vector.load %arg3[%c0_134, %c0_135] : memref<8x64xf32, #tpu.memory_space<vmem>>, vector<8x64xf32>
    tpu.vector_store %arg3[%c0_134, %c0_135], %284 {strides = array<i32>} : memref<8x64xf32, #tpu.memory_space<vmem>>, vector<8x64xf32>,
    return
  }
  func.func @transform_0(%arg0: i32) -> (i32, i32, i32) {
    %c0_i32 = arith.constant 0 : i32
    %c0_i32_0 = arith.constant 0 : i32
    %c0_i32_1 = arith.constant 0 : i32
    %c0_i32_2 = arith.constant 0 : i32
    return %c0_i32, %c0_i32_0, %c0_i32_1 : i32, i32, i32
  }
  func.func @transform_1(%arg0: i32) -> (i32, i32) {
    %c0_i32 = arith.constant 0 : i32
    %c0_i32_0 = arith.constant 0 : i32
    %c0_i32_1 = arith.constant 0 : i32
    return %c0_i32, %c0_i32_0 : i32, i32
  }
  func.func @transform_2(%arg0: i32) -> (i32, i32) {
    %c0_i32 = arith.constant 0 : i32
    %c0_i32_0 = arith.constant 0 : i32
    %c0_i32_1 = arith.constant 0 : i32
    return %c0_i32, %c0_i32_0 : i32, i32
  }
}

</mosaic_0001>

<bundles_post_ra>
// kernel: tpu_custom_call.1
= control target key start
LH: loop header
LB: loop body
LE: loop exit
PB: predicated region body
PF: predicated region fallthrough
CT: control target
= control target key end

     0   :  { %7 = vsyncpa [#allocation5], 0  ;;  %s1658_s0 = inlined_call_operand.hbm [shape: f32[8,8,256], index: 0, kind: input, shape index: {}]   ;;  %s1659_s1 = inlined_call_operand.hbm [shape: f32[64,256], index: 1, kind: input, shape index: {}]   ;;  %s1660_s2 = inlined_call_operand.hbm [shape: f32[8,64], index: 2, kind: output, shape index: {}]  }
   0x1   :  { %8 = vsyncpa [#allocation8], 0 }
   0x2   :  { %9 = vsyncpa [#allocation6], 0  ;;  %s1451_s9 = smov [#allocation4]   ;;  %s1379_s13 = scalar_lea.hbm %s1658_s0, 2048 }
   0x3   :  { %s15_s10 = sshll.u32 %s1451_s9, 4  ;;  %p1380_p0 = scmp.ne.s32.totalorder %s1658_s0, %s1379_s13  ;;  %s16_s10 = int_to_ptr.vmem [resolvable:$true] %s15_s10 }
   0x4   :  { %p1383_p1 = scmp.lt.u32.totalorder %s1379_s13, %s1658_s0 }
   0x6   :  { %p1385_p2 = pnand %p1383_p1, %p1380_p0 }
   0x8   :  { %1388 = shalt.err (!%p1385_p2)
}
   0x9   :  { %s1389_s18 = scalar_lea.vmem %s16_s10, 2048  ;;  %p1394_p4 = scmp.lt.s32.totalorder %s16_s10, %s16_s10 }
   0xa   :  { %p1390_p3 = scmp.ne.s32.totalorder %s16_s10, %s1389_s18  ;;  %p1395_p5 = scmp.lt.s32.totalorder %s1389_s18, %s1389_s18 }
   0xc   :  { %p1396_p6 = por %p1395_p5, %p1394_p4 }
   0xe   :  { %p1397_p7 = pnand %p1396_p6, %p1390_p3 }
  0x10   :  { %1400 = shalt.err (!%p1397_p7)
}
  0x11   :  { %s1452_s19 = smov 256   ;;  %s1453_s20 = smov 16  }
  0x12   :  { %21 = dma.hbm_to_vmem [thread:$0]  %s1658_s0, 2048, %s16_s10, [#allocation5], %s1452_s19, %s1452_s19, %s1453_s20  }
  0x13   :  { %s1454_s23 = smov [#allocation7]   ;;  %s1401_s27 = scalar_lea.hbm %s1659_s1, 2048 }
  0x14   :  { %s27_s24 = sshll.u32 %s1454_s23, 4  ;;  %p1402_p8 = scmp.ne.s32.totalorder %s1659_s1, %s1401_s27  ;;  %s28_s24 = int_to_ptr.vmem [resolvable:$true] %s27_s24 }
  0x15   :  { %p1405_p9 = scmp.lt.u32.totalorder %s1401_s27, %s1659_s1 }
  0x17   :  { %p1407_p10 = pnand %p1405_p9, %p1402_p8 }
  0x19   :  { %1410 = shalt.err (!%p1407_p10)
}
  0x1a   :  { %s1411_s4 = scalar_lea.vmem %s28_s24, 2048  ;;  %p1416_p12 = scmp.lt.s32.totalorder %s28_s24, %s28_s24 }
  0x1b   :  { %p1412_p11 = scmp.ne.s32.totalorder %s28_s24, %s1411_s4  ;;  %p1417_p13 = scmp.lt.s32.totalorder %s1411_s4, %s1411_s4 }
  0x1d   :  { %p1418_p0 = por %p1417_p13, %p1416_p12 }
  0x1f   :  { %p1419_p1 = pnand %p1418_p0, %p1412_p11 }
  0x21   :  { %1422 = shalt.err (!%p1419_p1)
}
  0x22   :  { %33 = dma.hbm_to_vmem [thread:$0]  %s1659_s1, 2048, %s28_s24, [#allocation8], %s1452_s19, %s1452_s19, %s1453_s20  }
  0x23   :  { %1445 = dma.done.wait [#allocation5], 2048  }
  0x24   :  { %1446 = vsyncadd [#allocation5], 4294965248 }
  0x25   :  { %1447 = dma.done.wait [#allocation8], 2048  }
  0x26   :  { %1448 = vsyncadd [#allocation8], 4294965248  ;;  %vm40_vm0 = vcmask 523264   ;;  %v1455_v0 = vmov 0.0   ;;  %v47_v1 = vld [vmem:[#allocation7 + $0x8] sm:$0xff]  ;;  %v49_v2 = vld [vmem:[#allocation7 + $0x18] sm:$0xff] }
  0x27   :  { %129 = vmatprep.mubr.f32.mxu0 %v1455_v0  ;;  %41 = vst.msk [vmem:[#allocation2] sm:$0xff] %vm40_vm0, %v1455_v0  ;;  %42 = vst.msk [vmem:[#allocation3] sm:$0xff] %vm40_vm0, %v1455_v0  ;;  %262 = vmatprep.mubr.f32.mxu1 %v1455_v0  ;;  %v46_v3 = vld [vmem:[#allocation7] sm:$0xff]  ;;  %v1503_v4 = vpack.c.bf16 %v49_v2, %v47_v1  ;;  %v48_v5 = vld [vmem:[#allocation7 + $0x10] sm:$0xff]  ;;  %s1456_s1 = smov 64   ;;  %s1457_s6 = smov [#allocation9]  }
  0x28   :  { %v51_v6 = vld [vmem:[#allocation7 + $0x28] sm:$0xff]  ;;  %v53_v7 = vld [vmem:[#allocation7 + $0x38] sm:$0xff]  ;;  %v1505_v8 = vpack.c.bf16 %v48_v5, %v46_v3  ;;  %v50_v10 = vld [vmem:[#allocation7 + $0x20] sm:$0xff]  ;;  %s1114_s7 = sshll.u32 %s1457_s6, 4  ;;  %s1115_s7 = int_to_ptr.vmem [resolvable:$true] %s1114_s7 }
  0x29   :  { %v1507_v9 = vpack.c.bf16 %v53_v7, %v51_v6  ;;  %v52_v11 = vld [vmem:[#allocation7 + $0x30] sm:$0xff]  ;;  %v55_v12 = vld [vmem:[#allocation7 + $0x48] sm:$0xff]  ;;  %1149 = vmatprep.subr.bf16.mxu0 %v1503_v4  ;;  %v57_v13 = vld [vmem:[#allocation7 + $0x58] sm:$0xff]  ;;  %1165 = vmatprep.subr.bf16.mxu1 %v1503_v4  ;;  %s1423_s8 = scalar_lea.vmem %s1115_s7, 128  ;;  %p1428_p3 = scmp.lt.s32.totalorder %s1115_s7, %s1115_s7 }
  0x2a   :  { %1151 = vmatpush1.bf16.msra.mxu0 %v1505_v8  ;;  %v1512_v14 = vpack.c.bf16 %v52_v11, %v50_v10  ;;  %1167 = vmatpush1.bf16.msra.mxu1 %v1505_v8  ;;  %v1516_v15 = vpack.c.bf16 %v57_v13, %v55_v12  ;;  %v54_v16 = vld [vmem:[#allocation7 + $0x40] sm:$0xff]  ;;  %v56_v17 = vld [vmem:[#allocation7 + $0x50] sm:$0xff]  ;;  %v59_v19 = vld [vmem:[#allocation7 + $0x68] sm:$0xff]  ;;  %p1424_p2 = scmp.ne.s32.totalorder %s1115_s7, %s1423_s8  ;;  %p1429_p4 = scmp.lt.s32.totalorder %s1423_s8, %s1423_s8 }
  0x2b   :  { %1153 = vmatprep.subr.bf16.mxu0 %v1507_v9  ;;  %1169 = vmatprep.subr.bf16.mxu1 %v1507_v9  ;;  %v61_v20 = vld [vmem:[#allocation7 + $0x78] sm:$0xff]  ;;  %v1521_v21 = vpack.c.bf16 %v56_v17, %v54_v16  ;;  %v58_v23 = vld [vmem:[#allocation7 + $0x60] sm:$0xff]  ;;  %v60_v24 = vld [vmem:[#allocation7 + $0x70] sm:$0xff] }
  0x2c   :  { %v1525_v22 = vpack.c.bf16 %v61_v20, %v59_v19  ;;  %v1529_v25 = vpack.c.bf16 %v60_v24, %v58_v23  ;;  %v43_v27 = vld [vmem:[#allocation4] sm:$0xff]  ;;  %v44_v32 = vld [vmem:[#allocation4 + $0x8] sm:$0xff]  ;;  %v176_v53 = vld [vmem:[#allocation4 + $0x10] sm:$0xff]  ;;  %p1430_p5 = por %p1429_p4, %p1428_p3 }
  0x2d   :  { %v177_v58 = vld [vmem:[#allocation4 + $0x18] sm:$0xff]  ;;  %v309_v23 = vld [vmem:[#allocation4 + $0x20] sm:$0xff] }
  0x2e   :  { %v151_v18 = vld [vmem:[#allocation3] sm:$0xff]  ;;  %1155 = vmatpush1.bf16.msra.mxu0 %v1512_v14  ;;  %1171 = vmatpush1.bf16.msra.mxu1 %v1512_v14  ;;  %v45_v26 = vld [vmem:[#allocation2] sm:$0xff]  ;;  %p1431_p6 = pnand %p1430_p5, %p1424_p2 }
  0x2f   :  { %153 = vrot.lane.b32.xlu0 %v151_v18, %s1456_s1  ;;  %1157 = vmatprep.subr.bf16.mxu0 %v1516_v15 }
  0x30   :  { %1173 = vmatprep.subr.bf16.mxu1 %v1516_v15 }
  0x32   :  { %1159 = vmatpush1.bf16.msra.mxu0 %v1521_v21  ;;  %1175 = vmatpush1.bf16.msra.mxu1 %v1521_v21 }
  0x33   :  { %1161 = vmatprep.subr.bf16.mxu0 %v1525_v22  ;;  %1177 = vmatprep.subr.bf16.mxu1 %v1525_v22 }
  0x36   :  { %1163 = vmatpush1.bf16.msra.mxu0 %v1529_v25  ;;  %1179 = vmatpush1.bf16.msra.mxu1 %v1529_v25 }
  0x37   :  { %1181 = vmatprep.subr.bf16.mxu0 %v1503_v4  ;;  %1197 = vmatprep.subr.bf16.mxu1 %v1503_v4 }
  0x39   :  { %1124 = vmatmul.mubr.msk.f32.vlgmr.msra.gmra.mrb[0].mxu0 %vm40_vm0, %v45_v26 }
  0x3a   :  { %1183 = vmatpush1.bf16.msra.mxu0 %v1505_v8  ;;  %395 = vmatprep.mubr.f32.mxu0 %v1455_v0 }
  0x3b   :  { %1185 = vmatprep.subr.bf16.mxu0 %v1507_v9 }
  0x3e   :  { %1187 = vmatpush1.bf16.msra.mxu0 %v1512_v14 }
  0x3f   :  { %1189 = vmatprep.subr.bf16.mxu0 %v1516_v15 }
  0x42   :  { %1191 = vmatpush1.bf16.msra.mxu0 %v1521_v21 }
  0x43   :  { %1193 = vmatprep.subr.bf16.mxu0 %v1525_v22 }
  0x46   :  { %1195 = vmatpush1.bf16.msra.mxu0 %v1529_v25 }
  0x47   :  { %1213 = vmatprep.subr.bf16.mxu0 %v1503_v4 }
  0xa1   :  { %v154_v41 = vpop.permute.xlu0 %153 }
 0x10c   :  { %v131_v28 = vpop.f32.mrb[0].mxu0 }
 0x10d   :  { %v136_v29 = vadd.f32 %v131_v28, %v43_v27  ;;  %v133_v30 = vpop.f32.mrb[1].mxu0 }
 0x10e   :  { %v137_v33 = vadd.f32 %v133_v30, %v44_v32 }
 0x10f   :  { %v1125_v31 = vmul.f32 -1.442695, %v136_v29  ;;  %v310_v29 = vld [vmem:[#allocation4 + $0x28] sm:$0xff] }
 0x110   :  { %v1126_v39 = vmul.f32 -1.442695, %v137_v33 }
 0x111   :  { %1283 = vpow2.f32 %v1125_v31 }
 0x112   :  { %1285 = vtanh.f32 %v137_v33 }
 0x11b   :  { %v1284_v34 = vpop.eup %1283 }
 0x11c   :  { %v141_v35 = vadd.f32 1.0, %v1284_v34  ;;  %v1286_v36 = vpop.eup %1285 }
 0x11e   :  { %1287 = vrcp.f32 %v141_v35 }
 0x11f   :  { %1289 = vpow2.f32 %v1126_v39 }
 0x128   :  { %v1288_v37 = vpop.eup %1287 }
 0x129   :  { %v157_v38 = vmul.f32 %v1288_v37, %v1286_v36  ;;  %v1290_v40 = vpop.eup %1289  ;;  %v156_v43 = vmul.f32 %v1288_v37, %v154_v41 }
 0x12a   :  { %v148_v42 = vadd.f32 1.0, %v1290_v40 }
 0x12b   :  { %159 = vrot.lane.b32.xlu0 %v157_v38, %s1456_s1 }
 0x12c   :  { %1291 = vrcp.f32 %v148_v42 }
 0x136   :  { %v1292_v46 = vpop.eup %1291 }
 0x19d   :  { %v160_v44 = vpop.permute.xlu0 %159 }
 0x19e   :  { %v162_v45 = vadd.f32 %v160_v44, %v156_v43 }
 0x1a0   :  { %1293 = vtanh.f32 %v162_v45 }
 0x1aa   :  { %v1294_v47 = vpop.eup %1293 }
 0x1ab   :  { %v164_v48 = vmul.f32 %v1294_v47, %v1292_v46 }
 0x1ad   :  { %166 = vrot.lane.b32.xlu1 %v164_v48, %s1456_s1 }
 0x1b1   :  { %171 = vrot.lane.b32.xlu1 %v162_v45, %s1456_s1 }
 0x21f   :  { %v167_v49 = vpop.permute.xlu1 %166 }
 0x220   :  { %169 = vst.msk [vmem:[#allocation2] sm:$0xff] %vm40_vm0, %v167_v49 }
 0x223   :  { %v172_v50 = vpop.permute.xlu1 %171 }
 0x224   :  { %174 = vst.msk [vmem:[#allocation3] sm:$0xff] %vm40_vm0, %v172_v50  ;;  %v442_v50 = vld [vmem:[#allocation4 + $0x30] sm:$0xff] }
 0x227   :  { %v178_v51 = vld [vmem:[#allocation2] sm:$0xff] }
 0x228   :  { %1127 = vmatmul.mubr.msk.f32.vlgmr.msra.gmra.mrb[0].mxu1 %vm40_vm0, %v178_v51 }
 0x229   :  { %1199 = vmatpush1.bf16.msra.mxu1 %v1505_v8  ;;  %528 = vmatprep.mubr.f32.mxu1 %v1455_v0 }
 0x22a   :  { %1201 = vmatprep.subr.bf16.mxu1 %v1507_v9 }
 0x22b   :  { %v284_v52 = vld [vmem:[#allocation3] sm:$0xff] }
 0x22c   :  { %286 = vrot.lane.b32.xlu0 %v284_v52, %s1456_s1 }
 0x22d   :  { %1203 = vmatpush1.bf16.msra.mxu1 %v1512_v14 }
 0x22e   :  { %1205 = vmatprep.subr.bf16.mxu1 %v1516_v15 }
 0x231   :  { %1207 = vmatpush1.bf16.msra.mxu1 %v1521_v21 }
 0x232   :  { %1209 = vmatprep.subr.bf16.mxu1 %v1525_v22 }
 0x235   :  { %1211 = vmatpush1.bf16.msra.mxu1 %v1529_v25 }
 0x236   :  { %1229 = vmatprep.subr.bf16.mxu1 %v1503_v4 }
 0x29e   :  { %v287_v5 = vpop.permute.xlu0 %286 }
 0x2fb   :  { %v264_v54 = vpop.f32.mrb[0].mxu1 }
 0x2fc   :  { %v269_v55 = vadd.f32 %v264_v54, %v176_v53  ;;  %v266_v56 = vpop.f32.mrb[1].mxu1 }
 0x2fd   :  { %v270_v59 = vadd.f32 %v266_v56, %v177_v58 }
 0x2fe   :  { %v1128_v57 = vmul.f32 -1.442695, %v269_v55  ;;  %v443_v55 = vld [vmem:[#allocation4 + $0x38] sm:$0xff] }
 0x2ff   :  { %v1129_v2 = vmul.f32 -1.442695, %v270_v59 }
 0x300   :  { %1295 = vpow2.f32 %v1128_v57 }
 0x301   :  { %1297 = vtanh.f32 %v270_v59 }
 0x30a   :  { %v1296_v60 = vpop.eup %1295 }
 0x30b   :  { %v274_v61 = vadd.f32 1.0, %v1296_v60  ;;  %v1298_v62 = vpop.eup %1297 }
 0x30d   :  { %1299 = vrcp.f32 %v274_v61 }
 0x30e   :  { %1301 = vpow2.f32 %v1129_v2 }
 0x317   :  { %v1300_v63 = vpop.eup %1299 }
 0x318   :  { %v290_v1 = vmul.f32 %v1300_v63, %v1298_v62  ;;  %v1302_v3 = vpop.eup %1301  ;;  %v289_v7 = vmul.f32 %v1300_v63, %v287_v5 }
 0x319   :  { %v281_v6 = vadd.f32 1.0, %v1302_v3 }
 0x31a   :  { %292 = vrot.lane.b32.xlu1 %v290_v1, %s1456_s1 }
 0x31b   :  { %1303 = vrcp.f32 %v281_v6 }
 0x325   :  { %v1304_v12 = vpop.eup %1303 }
 0x38c   :  { %v293_v10 = vpop.permute.xlu1 %292 }
 0x38d   :  { %v295_v11 = vadd.f32 %v293_v10, %v289_v7 }
 0x38f   :  { %1305 = vtanh.f32 %v295_v11  ;;  %304 = vrot.lane.b32.xlu1 %v295_v11, %s1456_s1 }
 0x399   :  { %v1306_v13 = vpop.eup %1305 }
 0x39a   :  { %v297_v16 = vmul.f32 %v1306_v13, %v1304_v12 }
 0x39c   :  { %299 = vrot.lane.b32.xlu0 %v297_v16, %s1456_s1 }
 0x401   :  { %v305_v17 = vpop.permute.xlu1 %304 }
 0x402   :  { %307 = vst.msk [vmem:[#allocation3] sm:$0xff] %vm40_vm0, %v305_v17  ;;  %v575_v17 = vld [vmem:[#allocation4 + $0x40] sm:$0xff] }
 0x409   :  { %v417_v18 = vld [vmem:[#allocation3] sm:$0xff] }
 0x40a   :  { %419 = vrot.lane.b32.xlu0 %v417_v18, %s1456_s1 }
 0x40e   :  { %v300_v19 = vpop.permute.xlu0 %299 }
 0x40f   :  { %302 = vst.msk [vmem:[#allocation2] sm:$0xff] %vm40_vm0, %v300_v19 }
 0x416   :  { %v311_v20 = vld [vmem:[#allocation2] sm:$0xff] }
 0x417   :  { %1130 = vmatmul.mubr.msk.f32.vlgmr.msra.gmra.mrb[2].mxu0 %vm40_vm0, %v311_v20 }
 0x418   :  { %1215 = vmatpush1.bf16.msra.mxu0 %v1505_v8  ;;  %661 = vmatprep.mubr.f32.mxu0 %v1455_v0 }
 0x419   :  { %1217 = vmatprep.subr.bf16.mxu0 %v1507_v9 }
 0x41c   :  { %1219 = vmatpush1.bf16.msra.mxu0 %v1512_v14 }
 0x41d   :  { %1221 = vmatprep.subr.bf16.mxu0 %v1516_v15 }
 0x420   :  { %1223 = vmatpush1.bf16.msra.mxu0 %v1521_v21 }
 0x421   :  { %1225 = vmatprep.subr.bf16.mxu0 %v1525_v22 }
 0x424   :  { %1227 = vmatpush1.bf16.msra.mxu0 %v1529_v25 }
 0x425   :  { %1245 = vmatprep.subr.bf16.mxu0 %v1503_v4 }
 0x47c   :  { %v420_v38 = vpop.permute.xlu0 %419 }
 0x4ea   :  { %v397_v24 = vpop.f32.mrb[2].mxu0 }
 0x4eb   :  { %v402_v26 = vadd.f32 %v397_v24, %v309_v23  ;;  %v399_v27 = vpop.f32.mrb[3].mxu0  ;;  %v576_v24 = vld [vmem:[#allocation4 + $0x48] sm:$0xff] }
 0x4ec   :  { %v403_v30 = vadd.f32 %v399_v27, %v310_v29 }
 0x4ed   :  { %v1131_v28 = vmul.f32 -1.442695, %v402_v26 }
 0x4ee   :  { %v1132_v36 = vmul.f32 -1.442695, %v403_v30 }
 0x4ef   :  { %1307 = vpow2.f32 %v1131_v28 }
 0x4f0   :  { %1309 = vtanh.f32 %v403_v30 }
 0x4f9   :  { %v1308_v31 = vpop.eup %1307 }
 0x4fa   :  { %v407_v32 = vadd.f32 1.0, %v1308_v31  ;;  %v1310_v33 = vpop.eup %1309 }
 0x4fc   :  { %1311 = vrcp.f32 %v407_v32 }
 0x4fd   :  { %1313 = vpow2.f32 %v1132_v36 }
 0x506   :  { %v1312_v34 = vpop.eup %1311 }
 0x507   :  { %v423_v35 = vmul.f32 %v1312_v34, %v1310_v33  ;;  %v1314_v37 = vpop.eup %1313  ;;  %v422_v40 = vmul.f32 %v1312_v34, %v420_v38 }
 0x508   :  { %v414_v39 = vadd.f32 1.0, %v1314_v37 }
 0x509   :  { %425 = vrot.lane.b32.xlu1 %v423_v35, %s1456_s1 }
 0x50a   :  { %1315 = vrcp.f32 %v414_v39 }
 0x514   :  { %v1316_v43 = vpop.eup %1315 }
 0x57b   :  { %v426_v41 = vpop.permute.xlu1 %425 }
 0x57c   :  { %v428_v42 = vadd.f32 %v426_v41, %v422_v40 }
 0x57e   :  { %1317 = vtanh.f32 %v428_v42  ;;  %437 = vrot.lane.b32.xlu1 %v428_v42, %s1456_s1 }
 0x588   :  { %v1318_v44 = vpop.eup %1317 }
 0x589   :  { %v430_v45 = vmul.f32 %v1318_v44, %v1316_v43 }
 0x58b   :  { %432 = vrot.lane.b32.xlu0 %v430_v45, %s1456_s1 }
 0x5f0   :  { %v438_v46 = vpop.permute.xlu1 %437 }
 0x5f1   :  { %440 = vst.msk [vmem:[#allocation3] sm:$0xff] %vm40_vm0, %v438_v46  ;;  %v708_v46 = vld [vmem:[#allocation4 + $0x50] sm:$0xff] }
 0x5f8   :  { %v550_v47 = vld [vmem:[#allocation3] sm:$0xff] }
 0x5f9   :  { %552 = vrot.lane.b32.xlu0 %v550_v47, %s1456_s1 }
 0x5fd   :  { %v433_v48 = vpop.permute.xlu0 %432 }
 0x5fe   :  { %435 = vst.msk [vmem:[#allocation2] sm:$0xff] %vm40_vm0, %v433_v48 }
 0x605   :  { %v444_v49 = vld [vmem:[#allocation2] sm:$0xff] }
 0x606   :  { %1133 = vmatmul.mubr.msk.f32.vlgmr.msra.gmra.mrb[2].mxu1 %vm40_vm0, %v444_v49 }
 0x607   :  { %1231 = vmatpush1.bf16.msra.mxu1 %v1505_v8  ;;  %794 = vmatprep.mubr.f32.mxu1 %v1455_v0 }
 0x608   :  { %1233 = vmatprep.subr.bf16.mxu1 %v1507_v9 }
 0x60b   :  { %1235 = vmatpush1.bf16.msra.mxu1 %v1512_v14 }
 0x60c   :  { %1237 = vmatprep.subr.bf16.mxu1 %v1516_v15 }
 0x60f   :  { %1239 = vmatpush1.bf16.msra.mxu1 %v1521_v21 }
 0x610   :  { %1241 = vmatprep.subr.bf16.mxu1 %v1525_v22 }
 0x613   :  { %1243 = vmatpush1.bf16.msra.mxu1 %v1529_v25 }
 0x614   :  { %1261 = vmatprep.subr.bf16.mxu1 %v1503_v4 }
 0x66b   :  { %v553_v63 = vpop.permute.xlu0 %552 }
 0x6d9   :  { %v530_v51 = vpop.f32.mrb[2].mxu1 }
 0x6da   :  { %v535_v52 = vadd.f32 %v530_v51, %v442_v50  ;;  %v532_v53 = vpop.f32.mrb[3].mxu1 }
 0x6db   :  { %v536_v56 = vadd.f32 %v532_v53, %v443_v55 }
 0x6dc   :  { %v1134_v54 = vmul.f32 -1.442695, %v535_v52 }
 0x6dd   :  { %v1135_v62 = vmul.f32 -1.442695, %v536_v56 }
 0x6de   :  { %1319 = vpow2.f32 %v1134_v54 }
 0x6df   :  { %1321 = vtanh.f32 %v536_v56 }
 0x6e8   :  { %v1320_v57 = vpop.eup %1319 }
 0x6e9   :  { %v540_v58 = vadd.f32 1.0, %v1320_v57  ;;  %v1322_v59 = vpop.eup %1321 }
 0x6eb   :  { %1323 = vrcp.f32 %v540_v58 }
 0x6ec   :  { %1325 = vpow2.f32 %v1135_v62 }
 0x6f5   :  { %v1324_v60 = vpop.eup %1323 }
 0x6f6   :  { %v556_v61 = vmul.f32 %v1324_v60, %v1322_v59  ;;  %v1326_v4 = vpop.eup %1325  ;;  %v555_v2 = vmul.f32 %v1324_v60, %v553_v63  ;;  %v841_v63 = vld [vmem:[#allocation4 + $0x60] sm:$0xff] }
 0x6f7   :  { %v547_v1 = vadd.f32 1.0, %v1326_v4 }
 0x6f8   :  { %558 = vrot.lane.b32.xlu1 %v556_v61, %s1456_s1 }
 0x6f9   :  { %1327 = vrcp.f32 %v547_v1 }
 0x703   :  { %v1328_v6 = vpop.eup %1327 }
 0x76a   :  { %v559_v3 = vpop.permute.xlu1 %558 }
 0x76b   :  { %v561_v5 = vadd.f32 %v559_v3, %v555_v2 }
 0x76d   :  { %1329 = vtanh.f32 %v561_v5  ;;  %570 = vrot.lane.b32.xlu1 %v561_v5, %s1456_s1 }
 0x777   :  { %v1330_v7 = vpop.eup %1329 }
 0x778   :  { %v563_v10 = vmul.f32 %v1330_v7, %v1328_v6  ;;  %v842_v6 = vld [vmem:[#allocation4 + $0x68] sm:$0xff] }
 0x77a   :  { %565 = vrot.lane.b32.xlu0 %v563_v10, %s1456_s1 }
 0x7df   :  { %v571_v11 = vpop.permute.xlu1 %570 }
 0x7e0   :  { %573 = vst.msk [vmem:[#allocation3] sm:$0xff] %vm40_vm0, %v571_v11 }
 0x7e7   :  { %v683_v12 = vld [vmem:[#allocation3] sm:$0xff] }
 0x7e8   :  { %685 = vrot.lane.b32.xlu0 %v683_v12, %s1456_s1 }
 0x7ec   :  { %v566_v13 = vpop.permute.xlu0 %565 }
 0x7ed   :  { %568 = vst.msk [vmem:[#allocation2] sm:$0xff] %vm40_vm0, %v566_v13 }
 0x7f4   :  { %v577_v16 = vld [vmem:[#allocation2] sm:$0xff] }
 0x7f5   :  { %1136 = vmatmul.mubr.msk.f32.vlgmr.msra.gmra.mrb[4].mxu0 %vm40_vm0, %v577_v16 }
 0x7f6   :  { %1247 = vmatpush1.bf16.msra.mxu0 %v1505_v8  ;;  %927 = vmatprep.mubr.f32.mxu0 %v1455_v0 }
 0x7f7   :  { %1249 = vmatprep.subr.bf16.mxu0 %v1507_v9 }
 0x7fa   :  { %1251 = vmatpush1.bf16.msra.mxu0 %v1512_v14 }
 0x7fb   :  { %1253 = vmatprep.subr.bf16.mxu0 %v1516_v15 }
 0x7fe   :  { %1255 = vmatpush1.bf16.msra.mxu0 %v1521_v21 }
 0x7ff   :  { %1257 = vmatprep.subr.bf16.mxu0 %v1525_v22 }
 0x802   :  { %1259 = vmatpush1.bf16.msra.mxu0 %v1529_v25 }
 0x85a   :  { %v686_v34 = vpop.permute.xlu0 %685 }
 0x8c8   :  { %v663_v18 = vpop.f32.mrb[4].mxu0 }
 0x8c9   :  { %v668_v19 = vadd.f32 %v663_v18, %v575_v17  ;;  %v665_v20 = vpop.f32.mrb[5].mxu0 }
 0x8ca   :  { %v669_v26 = vadd.f32 %v665_v20, %v576_v24 }
 0x8cb   :  { %v1137_v23 = vmul.f32 -1.442695, %v668_v19 }
 0x8cc   :  { %v1138_v32 = vmul.f32 -1.442695, %v669_v26 }
 0x8cd   :  { %1331 = vpow2.f32 %v1137_v23 }
 0x8ce   :  { %1333 = vtanh.f32 %v669_v26 }
 0x8d7   :  { %v1332_v27 = vpop.eup %1331 }
 0x8d8   :  { %v673_v28 = vadd.f32 1.0, %v1332_v27  ;;  %v1334_v29 = vpop.eup %1333 }
 0x8da   :  { %1335 = vrcp.f32 %v673_v28 }
 0x8db   :  { %1337 = vpow2.f32 %v1138_v32 }
 0x8e4   :  { %v1336_v30 = vpop.eup %1335 }
 0x8e5   :  { %v689_v31 = vmul.f32 %v1336_v30, %v1334_v29  ;;  %v1338_v33 = vpop.eup %1337  ;;  %v688_v36 = vmul.f32 %v1336_v30, %v686_v34  ;;  %v974_v34 = vld [vmem:[#allocation4 + $0x70] sm:$0xff] }
 0x8e6   :  { %v680_v35 = vadd.f32 1.0, %v1338_v33 }
 0x8e7   :  { %691 = vrot.lane.b32.xlu1 %v689_v31, %s1456_s1 }
 0x8e8   :  { %1339 = vrcp.f32 %v680_v35 }
 0x8f2   :  { %v1340_v39 = vpop.eup %1339 }
 0x959   :  { %v692_v37 = vpop.permute.xlu1 %691 }
 0x95a   :  { %v694_v38 = vadd.f32 %v692_v37, %v688_v36 }
 0x95c   :  { %1341 = vtanh.f32 %v694_v38  ;;  %703 = vrot.lane.b32.xlu1 %v694_v38, %s1456_s1 }
 0x966   :  { %v1342_v40 = vpop.eup %1341 }
 0x967   :  { %v696_v41 = vmul.f32 %v1342_v40, %v1340_v39  ;;  %v975_v39 = vld [vmem:[#allocation4 + $0x78] sm:$0xff] }
 0x969   :  { %698 = vrot.lane.b32.xlu0 %v696_v41, %s1456_s1 }
 0x9ce   :  { %v704_v42 = vpop.permute.xlu1 %703 }
 0x9cf   :  { %706 = vst.msk [vmem:[#allocation3] sm:$0xff] %vm40_vm0, %v704_v42 }
 0x9d6   :  { %v816_v43 = vld [vmem:[#allocation3] sm:$0xff] }
 0x9d7   :  { %818 = vrot.lane.b32.xlu0 %v816_v43, %s1456_s1 }
 0x9db   :  { %v699_v44 = vpop.permute.xlu0 %698 }
 0x9dc   :  { %701 = vst.msk [vmem:[#allocation2] sm:$0xff] %vm40_vm0, %v699_v44 }
 0x9e3   :  { %v710_v45 = vld [vmem:[#allocation2] sm:$0xff] }
 0x9e4   :  { %1139 = vmatmul.mubr.msk.f32.vlgmr.msra.gmra.mrb[4].mxu1 %vm40_vm0, %v710_v45 }
 0x9e5   :  { %1263 = vmatpush1.bf16.msra.mxu1 %v1505_v8  ;;  %1060 = vmatprep.mubr.f32.mxu1 %v1455_v0  ;;  %v709_v8 = vld [vmem:[#allocation4 + $0x58] sm:$0xff] }
 0x9e6   :  { %1265 = vmatprep.subr.bf16.mxu1 %v1507_v9 }
 0x9e9   :  { %1267 = vmatpush1.bf16.msra.mxu1 %v1512_v14 }
 0x9ea   :  { %1269 = vmatprep.subr.bf16.mxu1 %v1516_v15 }
 0x9ed   :  { %1271 = vmatpush1.bf16.msra.mxu1 %v1521_v21 }
 0x9ee   :  { %1273 = vmatprep.subr.bf16.mxu1 %v1525_v22 }
 0x9f1   :  { %1275 = vmatpush1.bf16.msra.mxu1 %v1529_v25 }
 0xa49   :  { %v819_v25 = vpop.permute.xlu0 %818 }
 0xab7   :  { %v796_v47 = vpop.f32.mrb[4].mxu1 }
 0xab8   :  { %v801_v48 = vadd.f32 %v796_v47, %v708_v46  ;;  %v798_v49 = vpop.f32.mrb[5].mxu1 }
 0xab9   :  { %v802_v0 = vadd.f32 %v798_v49, %v709_v8 }
 0xaba   :  { %v1140_v50 = vmul.f32 -1.442695, %v801_v48 }
 0xabb   :  { %v1141_v21 = vmul.f32 -1.442695, %v802_v0 }
 0xabc   :  { %1343 = vpow2.f32 %v1140_v50 }
 0xabd   :  { %1345 = vtanh.f32 %v802_v0 }
 0xac6   :  { %v1344_v51 = vpop.eup %1343 }
 0xac7   :  { %v806_v9 = vadd.f32 1.0, %v1344_v51  ;;  %v1346_v14 = vpop.eup %1345 }
 0xac9   :  { %1347 = vrcp.f32 %v806_v9 }
 0xaca   :  { %1349 = vpow2.f32 %v1141_v21 }
 0xad3   :  { %v1348_v15 = vpop.eup %1347 }
 0xad4   :  { %v822_v52 = vmul.f32 %v1348_v15, %v1346_v14  ;;  %v1350_v22 = vpop.eup %1349  ;;  %v821_v54 = vmul.f32 %v1348_v15, %v819_v25 }
 0xad5   :  { %v813_v53 = vadd.f32 1.0, %v1350_v22 }
 0xad6   :  { %824 = vrot.lane.b32.xlu1 %v822_v52, %s1456_s1 }
 0xad7   :  { %1351 = vrcp.f32 %v813_v53 }
 0xae1   :  { %v1352_v57 = vpop.eup %1351 }
 0xb48   :  { %v825_v55 = vpop.permute.xlu1 %824 }
 0xb49   :  { %v827_v56 = vadd.f32 %v825_v55, %v821_v54 }
 0xb4b   :  { %1353 = vtanh.f32 %v827_v56  ;;  %836 = vrot.lane.b32.xlu1 %v827_v56, %s1456_s1 }
 0xb55   :  { %v1354_v58 = vpop.eup %1353 }
 0xb56   :  { %v829_v59 = vmul.f32 %v1354_v58, %v1352_v57 }
 0xb58   :  { %831 = vrot.lane.b32.xlu0 %v829_v59, %s1456_s1 }
 0xbbd   :  { %v837_v60 = vpop.permute.xlu1 %836 }
 0xbbe   :  { %839 = vst.msk [vmem:[#allocation3] sm:$0xff] %vm40_vm0, %v837_v60 }
 0xbc5   :  { %v949_v61 = vld [vmem:[#allocation3] sm:$0xff] }
 0xbc6   :  { %951 = vrot.lane.b32.xlu0 %v949_v61, %s1456_s1 }
 0xbca   :  { %v832_v62 = vpop.permute.xlu0 %831 }
 0xbcb   :  { %834 = vst.msk [vmem:[#allocation2] sm:$0xff] %vm40_vm0, %v832_v62 }
 0xbd2   :  { %v843_v4 = vld [vmem:[#allocation2] sm:$0xff] }
 0xbd3   :  { %1142 = vmatmul.mubr.msk.f32.vlgmr.msra.gmra.mrb[6].mxu0 %vm40_vm0, %v843_v4 }
 0xc38   :  { %v952_v19 = vpop.permute.xlu0 %951 }
 0xca6   :  { %v929_v1 = vpop.f32.mrb[6].mxu0 }
 0xca7   :  { %v934_v2 = vadd.f32 %v929_v1, %v841_v63  ;;  %v931_v3 = vpop.f32.mrb[7].mxu0 }
 0xca8   :  { %v935_v7 = vadd.f32 %v931_v3, %v842_v6 }
 0xca9   :  { %v1143_v5 = vmul.f32 -1.442695, %v934_v2 }
 0xcaa   :  { %v1144_v17 = vmul.f32 -1.442695, %v935_v7 }
 0xcab   :  { %1355 = vpow2.f32 %v1143_v5 }
 0xcac   :  { %1357 = vtanh.f32 %v935_v7 }
 0xcb5   :  { %v1356_v10 = vpop.eup %1355 }
 0xcb6   :  { %v939_v11 = vadd.f32 1.0, %v1356_v10  ;;  %v1358_v12 = vpop.eup %1357 }
 0xcb8   :  { %1359 = vrcp.f32 %v939_v11 }
 0xcb9   :  { %1361 = vpow2.f32 %v1144_v17 }
 0xcc2   :  { %v1360_v13 = vpop.eup %1359 }
 0xcc3   :  { %v955_v16 = vmul.f32 %v1360_v13, %v1358_v12  ;;  %v1362_v18 = vpop.eup %1361  ;;  %v954_v23 = vmul.f32 %v1360_v13, %v952_v19 }
 0xcc4   :  { %v946_v20 = vadd.f32 1.0, %v1362_v18 }
 0xcc5   :  { %957 = vrot.lane.b32.xlu1 %v955_v16, %s1456_s1 }
 0xcc6   :  { %1363 = vrcp.f32 %v946_v20 }
 0xcd0   :  { %v1364_v27 = vpop.eup %1363 }
 0xd37   :  { %v958_v24 = vpop.permute.xlu1 %957 }
 0xd38   :  { %v960_v26 = vadd.f32 %v958_v24, %v954_v23 }
 0xd3a   :  { %1365 = vtanh.f32 %v960_v26  ;;  %969 = vrot.lane.b32.xlu1 %v960_v26, %s1456_s1 }
 0xd44   :  { %v1366_v28 = vpop.eup %1365 }
 0xd45   :  { %v962_v29 = vmul.f32 %v1366_v28, %v1364_v27 }
 0xd47   :  { %964 = vrot.lane.b32.xlu0 %v962_v29, %s1456_s1 }
 0xdac   :  { %v970_v30 = vpop.permute.xlu1 %969 }
 0xdad   :  { %972 = vst.msk [vmem:[#allocation3] sm:$0xff] %vm40_vm0, %v970_v30 }
 0xdb4   :  { %v1082_v31 = vld [vmem:[#allocation3] sm:$0xff] }
 0xdb5   :  { %1084 = vrot.lane.b32.xlu0 %v1082_v31, %s1456_s1 }
 0xdb9   :  { %v965_v32 = vpop.permute.xlu0 %964 }
 0xdba   :  { %967 = vst.msk [vmem:[#allocation2] sm:$0xff] %vm40_vm0, %v965_v32 }
 0xdc1   :  { %v976_v33 = vld [vmem:[#allocation2] sm:$0xff] }
 0xdc2   :  { %1145 = vmatmul.mubr.msk.f32.vlgmr.msra.gmra.mrb[6].mxu1 %vm40_vm0, %v976_v33 }
 0xe27   :  { %v1085_v48 = vpop.permute.xlu0 %1084 }
 0xe95   :  { %v1062_v35 = vpop.f32.mrb[6].mxu1 }
 0xe96   :  { %v1067_v36 = vadd.f32 %v1062_v35, %v974_v34  ;;  %v1064_v37 = vpop.f32.mrb[7].mxu1 }
 0xe97   :  { %v1068_v40 = vadd.f32 %v1064_v37, %v975_v39 }
 0xe98   :  { %v1146_v38 = vmul.f32 -1.442695, %v1067_v36 }
 0xe99   :  { %v1147_v46 = vmul.f32 -1.442695, %v1068_v40 }
 0xe9a   :  { %1367 = vpow2.f32 %v1146_v38 }
 0xe9b   :  { %1369 = vtanh.f32 %v1068_v40 }
 0xea4   :  { %v1368_v41 = vpop.eup %1367 }
 0xea5   :  { %v1072_v42 = vadd.f32 1.0, %v1368_v41  ;;  %v1370_v43 = vpop.eup %1369 }
 0xea7   :  { %1371 = vrcp.f32 %v1072_v42 }
 0xea8   :  { %1373 = vpow2.f32 %v1147_v46 }
 0xeb1   :  { %v1372_v44 = vpop.eup %1371 }
 0xeb2   :  { %v1088_v45 = vmul.f32 %v1372_v44, %v1370_v43  ;;  %v1374_v47 = vpop.eup %1373  ;;  %v1087_v50 = vmul.f32 %v1372_v44, %v1085_v48 }
 0xeb3   :  { %v1079_v49 = vadd.f32 1.0, %v1374_v47 }
 0xeb4   :  { %1090 = vrot.lane.b32.xlu1 %v1088_v45, %s1456_s1 }
 0xeb5   :  { %1375 = vrcp.f32 %v1079_v49 }
 0xebf   :  { %v1376_v51 = vpop.eup %1375 }
 0xf26   :  { %v1091_v8 = vpop.permute.xlu1 %1090 }
 0xf27   :  { %v1093_v0 = vadd.f32 %v1091_v8, %v1087_v50 }
 0xf29   :  { %1377 = vtanh.f32 %v1093_v0  ;;  %1102 = vrot.lane.b32.xlu1 %v1093_v0, %s1456_s1 }
 0xf33   :  { %v1378_v9 = vpop.eup %1377 }
 0xf34   :  { %v1095_v14 = vmul.f32 %v1378_v9, %v1376_v51 }
 0xf36   :  { %1097 = vrot.lane.b32.xlu0 %v1095_v14, %s1456_s1 }
 0xf9b   :  { %v1103_v15 = vpop.permute.xlu1 %1102 }
 0xf9c   :  { %1105 = vst.msk [vmem:[#allocation3] sm:$0xff] %vm40_vm0, %v1103_v15 }
 0xfa8   :  { %v1098_v52 = vpop.permute.xlu0 %1097 }
 0xfa9   :  { %1100 = vst.msk [vmem:[#allocation2] sm:$0xff] %vm40_vm0, %v1098_v52 }
 0xfb0   :  { %v1106_v21 = vld [vmem:[#allocation2] sm:$0xff] }
 0xfb1   :  { %1107 = vst.msk [vmem:[#allocation9] sm:$0xff] %vm40_vm0, %v1106_v21 }
 0xfb2   :  { %1434 = shalt.err (!%p1431_p6)
}
 0xfb3   :  { %s1435_s11 = scalar_lea.hbm %s1660_s2, 128 }
 0xfb4   :  { %p1436_p7 = scmp.ne.s32.totalorder %s1660_s2, %s1435_s11  ;;  %p1439_p8 = scmp.lt.u32.totalorder %s1435_s11, %s1660_s2 }
 0xfb6   :  { %p1441_p9 = pnand %p1439_p8, %p1436_p7 }
 0xfb8   :  { %1444 = shalt.err (!%p1441_p9)
}
 0xfb9   :  { %1117 = dma.vmem_to_hbm [thread:$0]  %s1115_s7, 128, %s1660_s2, [#allocation6]  }
 0xfba   :  { %1449 = dma.done.wait [#allocation6], 128  }
 0xfbb   :  { %1450 = vsyncadd [#allocation6], 4294967168 }
 0xfbc   :  { %1121 = vsyncpa [#allocation5], 1 }
 0xfbd   :  { %1122 = vsyncpa [#allocation8], 1 }
 0xfbe   :  { %1123 = vsyncpa [#allocation6], 1 }

</bundles_post_ra>
